<compile_context>
chip_gen: v7x
topology: tpu7x:2x2x1
jax: 0.10.0
libtpu: 0.0.40
codegen_flags: <defaults>
</compile_context>

<pallas_src>
import numpy as np
import jax
import jax.numpy as jnp
from jax.experimental import pallas as pl
from jax.experimental.pallas import tpu as pltpu


# ----------------------------------------------------------------------------
# constant-matrix construction (numpy, trace-time)
# ----------------------------------------------------------------------------

def make_kernel_np(k):
    """Same as the PyTorch make_kernel, in numpy."""
    k = np.asarray(k, dtype=np.float64)
    if k.ndim == 1:
        k = np.outer(k, k)
    k = k / k.sum()
    return k


def _upfirdn1d_matrix(n, k1d, up, pad0, pad1):
    """U of shape (n, n*up) with  x @ U == upfirdn1d(x, k_eff, up, down=1, pad).

    k_eff is this axis' share of make_kernel(k1d) * up**2, flipped like
    upfirdn2d_native does before conv.  Out-of-range taps (the zero padding)
    are simply dropped, so no explicit padding is needed anywhere.
    """
    k1d = np.asarray(k1d, dtype=np.float64)
    k_eff = (k1d / k1d.sum()) * up          # per-axis separable factor
    kf = k_eff[::-1]                         # kernel flip (conv vs. corr)
    kw = kf.shape[0]
    out_len = n * up + pad0 + pad1 - kw + 1
    assert out_len == n * up, (out_len, n, up)   # this module's pad choice
    U = np.zeros((n, out_len), dtype=np.float64)
    for p in range(n):
        m = pad0 + up * p                    # position of x[p] in the padded,
        for i in range(kw):                  # zero-stuffed signal
            y = m - i
            if 0 <= y < out_len:
                U[p, y] += kf[i]
    return U.astype(np.float32)


# ----------------------------------------------------------------------------
# Pallas kernel: P planes (H, W) -> P output row-tiles (tho, Wo) per step
# ----------------------------------------------------------------------------

def _upsample_kernel(x_ref, uhT_ref, uw_ref, o_ref):
    P, H, W = x_ref.shape
    x = x_ref[...].astype(jnp.float32)                        # upcast in VMEM (free)
    # Horizontal pass: one MXU matmul with M = P*H rows.
    t = jnp.dot(x.reshape(P * H, W), uw_ref[...],
                preferred_element_type=jnp.float32)           # (P*H, Wo)
    uhT = uhT_ref[...]                                        # (tho, H)
    # Vertical pass: statically-unrolled per-plane 2-D matmuls (Mosaic-friendly).
    for p in range(P):
        tp = t[p * H:(p + 1) * H, :]                          # (H, Wo), static slice
        o_ref[p] = jnp.dot(uhT, tp,
                           preferred_element_type=jnp.float32).astype(o_ref.dtype)


# ----------------------------------------------------------------------------
# tiling selection & wrapper
# ----------------------------------------------------------------------------

_VMEM_LIMIT_BYTES = 48 * 1024 * 1024    # explicit scoped-VMEM limit (v5e default is 16 MiB)
_STEP_BUDGET_BYTES = 12 * 1024 * 1024   # target per-grid-step VMEM working set


def _select_tiling(nplanes, H, W, Ho, Wo, in_item, out_item, budget):
    """Pick (P planes per step, tho output rows per step)."""
    def step_bytes(P, tho):
        xin = 2 * P * H * W * in_item               # double-buffered input
        xout = 2 * P * tho * Wo * out_item          # double-buffered output
        tmp = P * H * Wo * 4 + P * H * W * 4        # f32 intermediate + upcast
        consts = tho * H * 4 + W * Wo * 4           # constants (single-buffered)
        return xin + xout + tmp + consts

    min_steps = min(nplanes, 4)                     # keep a few grid steps for megacore
    best_p = 1
    for P in range(1, nplanes + 1):
        if nplanes % P or nplanes // P < min_steps:
            continue
        if step_bytes(P, Ho) <= budget:
            best_p = max(best_p, P)
    if step_bytes(best_p, Ho) <= budget:
        return best_p, Ho
    # Full plane does not fit VMEM budget: row-tile the output via UhT rows.
    row_tiles = [t for t in range(8, Ho, 8) if Ho % t == 0]
    for tho in sorted(row_tiles, reverse=True):
        if step_bytes(1, tho) <= budget:
            return 1, tho
    return 1, (row_tiles[0] if row_tiles else Ho)   # best effort (loud failure if too big)


def _call_pallas(planes, uhT, uw, P, tho, out_dtype, *, single_buffer_consts):
    nplanes, H, W = planes.shape
    Ho = uhT.shape[0]
    Wo = uw.shape[1]

    const_kw = {}
    if single_buffer_consts:
        # Grid-invariant constants: no need for a second pipeline buffer.
        const_kw = dict(pipeline_mode=pl.Buffered(1))

    flops = nplanes * 2 * (H * W * Wo + Ho * H * Wo)
    bytes_accessed = (planes.size * planes.dtype.itemsize
                      + nplanes * Ho * Wo * np.dtype(out_dtype).itemsize
                      + 4 * (uhT.size + uw.size))

    return pl.pallas_call(
        _upsample_kernel,
        out_shape=jax.ShapeDtypeStruct((nplanes, Ho, Wo), out_dtype),
        grid=(nplanes // P, Ho // tho),
        in_specs=[
            pl.BlockSpec((P, H, W), lambda i, j: (i, 0, 0)),        # batched input planes
            pl.BlockSpec((tho, H), lambda i, j: (j, 0), **const_kw),  # UhT row tile
            pl.BlockSpec((W, Wo), lambda i, j: (0, 0), **const_kw),   # Uw (VMEM-resident)
        ],
        out_specs=pl.BlockSpec((P, tho, Wo), lambda i, j: (i, j, 0)),
        compiler_params=pltpu.CompilerParams(
            dimension_semantics=("parallel", "parallel"),
            vmem_limit_bytes=_VMEM_LIMIT_BYTES),
        cost_estimate=pl.CostEstimate(
            flops=flops, transcendentals=0, bytes_accessed=bytes_accessed),
    )(planes, uhT, uw)


def upsample(x, kernel=(1, 3, 3, 1), factor=2):
    """Pallas equivalent of Upsample(kernel, factor).forward(x), x is NCHW."""
    N, C, H, W = x.shape
    klen = len(kernel)
    p = klen - factor
    pad0 = (p + 1) // 2 + factor - 1
    pad1 = p // 2
    Ho, Wo = H * factor, W * factor

    uh = _upfirdn1d_matrix(H, kernel, factor, pad0, pad1)    # (H, Ho)
    uw = _upfirdn1d_matrix(W, kernel, factor, pad0, pad1)    # (W, Wo)
    uhT = jnp.asarray(uh.T, dtype=jnp.float32)               # (Ho, H)
    uw = jnp.asarray(uw, dtype=jnp.float32)                  # (W, Wo)

    # Native-dtype planes: the f32 upcast happens inside the kernel in VMEM.
    planes = x.reshape(N * C, H, W)

    P, tho = _select_tiling(N * C, H, W, Ho, Wo,
                            planes.dtype.itemsize, x.dtype.itemsize,
                            _STEP_BUDGET_BYTES)

    try:
        out = _call_pallas(planes, uhT, uw, P, tho, x.dtype,
                           single_buffer_consts=True)
    except Exception:
        # pl.Buffered(1) not accepted by this jax/libtpu -> default double buffering.
        out = _call_pallas(planes, uhT, uw, P, tho, x.dtype,
                           single_buffer_consts=False)

    return out.reshape(N, C, Ho, Wo)


# ----------------------------------------------------------------------------
# pure-JAX reference (mirrors upfirdn2d_native) — used only for validation
# ----------------------------------------------------------------------------

def upfirdn2d_ref(x, k2d, up, pad):
    N, C, H, W = x.shape
    kh, kw = k2d.shape
    pad0, pad1 = pad
    z = jnp.zeros((N, C, H, up, W, up), x.dtype)
    z = z.at[:, :, :, 0, :, 0].set(x)                         # zero-stuffing
    z = z.reshape(N, C, H * up, W * up)
    z = jnp.pad(z, ((0, 0), (0, 0), (pad0, pad1), (pad0, pad1)))
    w = jnp.flip(jnp.asarray(k2d, x.dtype)).reshape(1, 1, kh, kw)
    out = jax.lax.conv_general_dilated(
        z.reshape(N * C, 1, z.shape[2], z.shape[3]), w,
        window_strides=(1, 1), padding="VALID",
        dimension_numbers=("NCHW", "OIHW", "NCHW"))
    return out.reshape(N, C, out.shape[2], out.shape[3])


if __name__ == "__main__":
    key = jax.random.PRNGKey(0)
    N, C, H, W = 2, 4, 16, 16
    x = jax.random.normal(key, (N, C, H, W), dtype=jnp.float32)   # NCHW, like PyTorch

    kernel = (1, 3, 3, 1)
    factor = 2

    # reference
    k2d = make_kernel_np(kernel) * factor ** 2
    pp = k2d.shape[0] - factor
    pad = ((pp + 1) // 2 + factor - 1, pp // 2)
    ref = upfirdn2d_ref(x, jnp.asarray(k2d, jnp.float32), factor, pad)

    # f32 path
    out = upsample(x, kernel=kernel, factor=factor)
    out = jax.block_until_ready(out)
    assert out.shape == (N, C, H * factor, W * factor), out.shape
    assert bool(jnp.all(jnp.isfinite(out)))
    err = float(jnp.max(jnp.abs(out - ref)))
    assert err < 2e-3, f"max abs err vs reference (f32): {err}"

    # bf16 path (native-dtype input, upcast happens in VMEM, bf16 output store)
    xb = x.astype(jnp.bfloat16)
    out_b = jax.block_until_ready(upsample(xb, kernel=kernel, factor=factor))
    ref_b = upfirdn2d_ref(xb.astype(jnp.float32), jnp.asarray(k2d, jnp.float32),
                          factor, pad)
    err_b = float(jnp.max(jnp.abs(out_b.astype(jnp.float32) - ref_b)))
    assert out_b.dtype == jnp.bfloat16
    assert err_b < 5e-2, f"max abs err vs reference (bf16): {err_b}"

    print("KERNEL_OK")
</pallas_src>

<mosaic_0001>
module attributes {stable_mosaic.version = 11 : i64} {
  func.func @_upsample_kernel(%arg0: i32, %arg1: i32, %arg2: memref<2x16x16xf32, #tpu.memory_space<vmem>>, %arg3: memref<32x16xf32, #tpu.memory_space<vmem>>, %arg4: memref<16x32xf32, #tpu.memory_space<vmem>>, %arg5: memref<2x32x32xf32, #tpu.memory_space<vmem>>) attributes {dimension_semantics = [#tpu.dimension_semantics<parallel>, #tpu.dimension_semantics<parallel>], iteration_bounds = array<i64: 4, 1>, scalar_prefetch = 0 : i64, scratch_operands = 0 : i64, tpu.core_type = #tpu.core_type<tc>, window_params = [{transform_indices = @transform_0, window_bounds = array<i64: 2, 16, 16>}, {pipeline_mode = #tpu.pipeline_mode<synchronous>, transform_indices = @transform_1, window_bounds = array<i64: 32, 16>}, {pipeline_mode = #tpu.pipeline_mode<synchronous>, transform_indices = @transform_2, window_bounds = array<i64: 16, 32>}, {transform_indices = @transform_3, window_bounds = array<i64: 2, 32, 32>}]} {
    %c0 = arith.constant 0 : index
    %c0_0 = arith.constant 0 : index
    %c0_1 = arith.constant 0 : index
    %0 = vector.load %arg2[%c0, %c0_0, %c0_1] : memref<2x16x16xf32, #tpu.memory_space<vmem>>, vector<2x16x16xf32>
    %1 = vector.shape_cast %0 : vector<2x16x16xf32> to vector<32x16xf32>
    %c0_2 = arith.constant 0 : index
    %c0_3 = arith.constant 0 : index
    %2 = vector.load %arg4[%c0_2, %c0_3] : memref<16x32xf32, #tpu.memory_space<vmem>>, vector<16x32xf32>
    %cst = arith.constant dense<0.000000e+00> : vector<32x32xf32>
    %3 = tpu.matmul %1, %2, %cst {dimension_numbers = #tpu.dot_dimension_numbers<[1], [0], [0], [1], [0, 0, 1, 1], [], []>} : vector<32x16xf32>, vector<16x32xf32>, vector<32x32xf32> -> vector<32x32xf32>
    %c0_4 = arith.constant 0 : index
    %c0_5 = arith.constant 0 : index
    %4 = vector.load %arg3[%c0_4, %c0_5] : memref<32x16xf32, #tpu.memory_space<vmem>>, vector<32x16xf32>
    %5 = vector.extract_strided_slice %3 {offsets = [0, 0], sizes = [16, 32], strides = [1, 1]} : vector<32x32xf32> to vector<16x32xf32>
    %cst_6 = arith.constant dense<0.000000e+00> : vector<32x32xf32>
    %6 = tpu.matmul %4, %5, %cst_6 {dimension_numbers = #tpu.dot_dimension_numbers<[1], [0], [0], [1], [0, 0, 1, 1], [], []>} : vector<32x16xf32>, vector<16x32xf32>, vector<32x32xf32> -> vector<32x32xf32>
    %c0_7 = arith.constant 0 : index
    %c0_8 = arith.constant 0 : index
    %c0_9 = arith.constant 0 : index
    %7 = vector.load %arg5[%c0_7, %c0_8, %c0_9] : memref<2x32x32xf32, #tpu.memory_space<vmem>>, vector<1x32x32xf32>
    %8 = vector.shape_cast %7 : vector<1x32x32xf32> to vector<32x32xf32>
    %9 = vector.shape_cast %6 : vector<32x32xf32> to vector<1x32x32xf32>
    tpu.vector_store %arg5[%c0_7, %c0_8, %c0_9], %9 {strides = array<i32>} : memref<2x32x32xf32, #tpu.memory_space<vmem>>, vector<1x32x32xf32>,
    %10 = vector.extract_strided_slice %3 {offsets = [16, 0], sizes = [16, 32], strides = [1, 1]} : vector<32x32xf32> to vector<16x32xf32>
    %cst_10 = arith.constant dense<0.000000e+00> : vector<32x32xf32>
    %11 = tpu.matmul %4, %10, %cst_10 {dimension_numbers = #tpu.dot_dimension_numbers<[1], [0], [0], [1], [0, 0, 1, 1], [], []>} : vector<32x16xf32>, vector<16x32xf32>, vector<32x32xf32> -> vector<32x32xf32>
    %c1 = arith.constant 1 : index
    %c0_11 = arith.constant 0 : index
    %c0_12 = arith.constant 0 : index
    %12 = vector.load %arg5[%c1, %c0_11, %c0_12] : memref<2x32x32xf32, #tpu.memory_space<vmem>>, vector<1x32x32xf32>
    %13 = vector.shape_cast %12 : vector<1x32x32xf32> to vector<32x32xf32>
    %14 = vector.shape_cast %11 : vector<32x32xf32> to vector<1x32x32xf32>
    tpu.vector_store %arg5[%c1, %c0_11, %c0_12], %14 {strides = array<i32>} : memref<2x32x32xf32, #tpu.memory_space<vmem>>, vector<1x32x32xf32>,
    return
  }
  func.func @transform_0(%arg0: i32, %arg1: i32) -> (i32, i32, i32) {
    %c0_i32 = arith.constant 0 : i32
    %c0_i32_0 = arith.constant 0 : i32
    %c0_i32_1 = arith.constant 0 : i32
    return %arg0, %c0_i32, %c0_i32_0 : i32, i32, i32
  }
  func.func @transform_1(%arg0: i32, %arg1: i32) -> (i32, i32) {
    %c0_i32 = arith.constant 0 : i32
    %c0_i32_0 = arith.constant 0 : i32
    return %arg1, %c0_i32 : i32, i32
  }
  func.func @transform_2(%arg0: i32, %arg1: i32) -> (i32, i32) {
    %c0_i32 = arith.constant 0 : i32
    %c0_i32_0 = arith.constant 0 : i32
    %c0_i32_1 = arith.constant 0 : i32
    return %c0_i32, %c0_i32_0 : i32, i32
  }
  func.func @transform_3(%arg0: i32, %arg1: i32) -> (i32, i32, i32) {
    %c0_i32 = arith.constant 0 : i32
    %c0_i32_0 = arith.constant 0 : i32
    return %arg0, %arg1, %c0_i32 : i32, i32, i32
  }
}

module attributes {stable_mosaic.version = 11 : i64} {
  func.func @_upsample_kernel(%arg0: i32, %arg1: i32, %arg2: memref<2x16x16xf32, #tpu.memory_space<vmem>>, %arg3: memref<32x16xf32, #tpu.memory_space<vmem>>, %arg4: memref<16x32xf32, #tpu.memory_space<vmem>>, %arg5: memref<2x32x32xf32, #tpu.memory_space<vmem>>) attributes {dimension_semantics = [#tpu.dimension_semantics<parallel>, #tpu.dimension_semantics<parallel>], iteration_bounds = array<i64: 4, 1>, scalar_prefetch = 0 : i64, scratch_operands = 0 : i64, tpu.core_type = #tpu.core_type<tc>, window_params = [{transform_indices = @transform_0, window_bounds = array<i64: 2, 16, 16>}, {transform_indices = @transform_1, window_bounds = array<i64: 32, 16>}, {pipeline_mode = #tpu.pipeline_mode<synchronous>, transform_indices = @transform_2, window_bounds = array<i64: 16, 32>}, {transform_indices = @transform_3, window_bounds = array<i64: 2, 32, 32>}]} {
    %c0 = arith.constant 0 : index
    %c0_0 = arith.constant 0 : index
    %c0_1 = arith.constant 0 : index
    %0 = vector.load %arg2[%c0, %c0_0, %c0_1] : memref<2x16x16xf32, #tpu.memory_space<vmem>>, vector<2x16x16xf32>
    %1 = vector.shape_cast %0 : vector<2x16x16xf32> to vector<32x16xf32>
    %c0_2 = arith.constant 0 : index
    %c0_3 = arith.constant 0 : index
    %2 = vector.load %arg4[%c0_2, %c0_3] : memref<16x32xf32, #tpu.memory_space<vmem>>, vector<16x32xf32>
    %cst = arith.constant dense<0.000000e+00> : vector<32x32xf32>
    %3 = tpu.matmul %1, %2, %cst {dimension_numbers = #tpu.dot_dimension_numbers<[1], [0], [0], [1], [0, 0, 1, 1], [], []>} : vector<32x16xf32>, vector<16x32xf32>, vector<32x32xf32> -> vector<32x32xf32>
    %c0_4 = arith.constant 0 : index
    %c0_5 = arith.constant 0 : index
    %4 = vector.load %arg3[%c0_4, %c0_5] : memref<32x16xf32, #tpu.memory_space<vmem>>, vector<32x16xf32>
    %5 = vector.extract_strided_slice %3 {offsets = [0, 0], sizes = [16, 32], strides = [1, 1]} : vector<32x32xf32> to vector<16x32xf32>
    %cst_6 = arith.constant dense<0.000000e+00> : vector<32x32xf32>
    %6 = tpu.matmul %4, %5, %cst_6 {dimension_numbers = #tpu.dot_dimension_numbers<[1], [0], [0], [1], [0, 0, 1, 1], [], []>} : vector<32x16xf32>, vector<16x32xf32>, vector<32x32xf32> -> vector<32x32xf32>
    %c0_7 = arith.constant 0 : index
    %c0_8 = arith.constant 0 : index
    %c0_9 = arith.constant 0 : index
    %7 = vector.load %arg5[%c0_7, %c0_8, %c0_9] : memref<2x32x32xf32, #tpu.memory_space<vmem>>, vector<1x32x32xf32>
    %8 = vector.shape_cast %7 : vector<1x32x32xf32> to vector<32x32xf32>
    %9 = vector.shape_cast %6 : vector<32x32xf32> to vector<1x32x32xf32>
    tpu.vector_store %arg5[%c0_7, %c0_8, %c0_9], %9 {strides = array<i32>} : memref<2x32x32xf32, #tpu.memory_space<vmem>>, vector<1x32x32xf32>,
    %10 = vector.extract_strided_slice %3 {offsets = [16, 0], sizes = [16, 32], strides = [1, 1]} : vector<32x32xf32> to vector<16x32xf32>
    %cst_10 = arith.constant dense<0.000000e+00> : vector<32x32xf32>
    %11 = tpu.matmul %4, %10, %cst_10 {dimension_numbers = #tpu.dot_dimension_numbers<[1], [0], [0], [1], [0, 0, 1, 1], [], []>} : vector<32x16xf32>, vector<16x32xf32>, vector<32x32xf32> -> vector<32x32xf32>
    %c1 = arith.constant 1 : index
    %c0_11 = arith.constant 0 : index
    %c0_12 = arith.constant 0 : index
    %12 = vector.load %arg5[%c1, %c0_11, %c0_12] : memref<2x32x32xf32, #tpu.memory_space<vmem>>, vector<1x32x32xf32>
    %13 = vector.shape_cast %12 : vector<1x32x32xf32> to vector<32x32xf32>
    %14 = vector.shape_cast %11 : vector<32x32xf32> to vector<1x32x32xf32>
    tpu.vector_store %arg5[%c1, %c0_11, %c0_12], %14 {strides = array<i32>} : memref<2x32x32xf32, #tpu.memory_space<vmem>>, vector<1x32x32xf32>,
    return
  }
  func.func @transform_0(%arg0: i32, %arg1: i32) -> (i32, i32, i32) {
    %c0_i32 = arith.constant 0 : i32
    %c0_i32_0 = arith.constant 0 : i32
    %c0_i32_1 = arith.constant 0 : i32
    return %arg0, %c0_i32, %c0_i32_0 : i32, i32, i32
  }
  func.func @transform_1(%arg0: i32, %arg1: i32) -> (i32, i32) {
    %c0_i32 = arith.constant 0 : i32
    %c0_i32_0 = arith.constant 0 : i32
    return %arg1, %c0_i32 : i32, i32
  }
  func.func @transform_2(%arg0: i32, %arg1: i32) -> (i32, i32) {
    %c0_i32 = arith.constant 0 : i32
    %c0_i32_0 = arith.constant 0 : i32
    %c0_i32_1 = arith.constant 0 : i32
    return %c0_i32, %c0_i32_0 : i32, i32
  }
  func.func @transform_3(%arg0: i32, %arg1: i32) -> (i32, i32, i32) {
    %c0_i32 = arith.constant 0 : i32
    %c0_i32_0 = arith.constant 0 : i32
    return %arg0, %arg1, %c0_i32 : i32, i32, i32
  }
}

</mosaic_0001>

<bundles_post_ra>
// kernel: tpu_custom_call.1
= control target key start
LH: loop header
LB: loop body
LE: loop exit
PB: predicated region body
PF: predicated region fallthrough
CT: control target
= control target key end

     0   :  { %8 = vsyncpa [#allocation3], 0  ;;  %s1163_s0 = inlined_call_operand.hbm [shape: f32[8,16,16], index: 0, kind: input, shape index: {}]   ;;  %s1164_s1 = inlined_call_operand.vmem [shape: f32[32,16], index: 1, kind: input, shape index: {}]   ;;  %s1165_s2 = inlined_call_operand.vmem [shape: f32[16,32], index: 2, kind: input, shape index: {}]   ;;  %s1166_s3 = inlined_call_operand.hbm [shape: f32[8,32,32], index: 3, kind: output, shape index: {}]  }
   0x1   :  { %10 = vsyncpa [#allocation3 + $0x1], 0 }
   0x2   :  { %11 = vsyncpa [#allocation4], 0 }
   0x3   :  { %13 = vsyncpa [#allocation4 + $0x1], 0  ;;  %s951_s12 = smov 0   ;;  %s953_s13 = smov 0  }
   0x4   :  { %s955_s14 = smov 0   ;;  %s957_s15 = smov 0  }
   0x5   :  { %s959_s16 = smov 0   ;;  %s961_s17 = smov 0  }
   0x6 LB: > { %s645_s18 = sadd.s32 4294967295, %s923_s17   ;;  %s646_s19 = sadd.s32 4294967294, %s923_s17   ;;  %s923_s17 = sphi %s961_s17, %s19_s17   ;;  %s919_s16 = sphi %s959_s16, %s1180_s16   ;;  %s915_s15 = sphi %s957_s15, %s1179_s15   ;;  %s911_s14 = sphi %s955_s14, %s1178_s14   ;;  %s907_s13 = sphi %s953_s13, %s1177_s13   ;;  %s903_s12 = sphi %s951_s12, %s1176_s12  }
   0x7   : > { %s31_s20 = sadd.s32 1, %s919_s16  ;;  %s38_s21 = sadd.s32 1, %s911_s14 }
   0x8   : > { %p33_p0 = scmp.ge.s32.totalorder %s31_s20, 4  ;;  %p45_p1 = scmp.ne.s32.totalorder %s911_s14, %s907_s13 }
   0x9   : > { %p46_p2 = scmp.eq.s32.totalorder %s923_s17, 0  ;;  %p51_p3 = scmp.ne.s32.totalorder %s907_s13, %s903_s12 }
   0xa   : > { %s1182_s20 = smov (%p33_p0, %s31_s20), 0  ;;  %p52_p5 = scmp.eq.s32.totalorder %s645_s18, 0 }
   0xb   : > { %p992_p4 = por %p46_p2, %p45_p1  ;;  %s35_s23 = ssub.s32 %s919_s16, %s1182_s20 }
   0xc   : > { %p124_p6 = scmp.eq.s32.totalorder %s645_s18, 3  ;;  %p36_p7 = scmp.eq.s32.totalorder %s35_s23, 0 }
   0xd   : > { %p998_p8 = por %p52_p5, %p51_p3  ;;  %p130_p10 = scmp.eq.s32.totalorder %s646_s19, 3 }
   0xe   : > { %p1002_p9 = por %p124_p6, %p45_p1  ;;  %p757_p12 = scmp.lt.s32.totalorder %s923_s17, 4 }
   0xf   : > { %s1007_s26 = scalar_select %p36_p7, %s911_s14, %s38_s21  }
  0x10   : > { %s1170_s25 = scalar_select %p1002_p9, 1, 0 }
  0x11   : > { %p1009_p11 = por %p130_p10, %p51_p3  ;;  %s162_s28 = sand.u32 1, %s911_s14  }
  0x12   : > { %s650_s29 = sshll.u32 %s162_s28, 5  ;;  %s680_s30 = sshll.u32 %s919_s16, 9 }
  0x13   : > { %s1171_s27 = scalar_select %p1009_p11, 1, 0 }
  0x14   : > { %s1019_s6 = scalar_lea.hbm %s1163_s0, %s680_s30  ;;  %s166_s7 = scalar_lea.vmem [#allocation2], %s650_s29 }
  0x15   : > { %s174_s8 = sshll.u32 %s166_s7, 4  ;;  %p1025_p13 = pnand %p757_p12, %p992_p4  ;;  %s1021_s8 = int_to_ptr.vmem [resolvable:$true] %s174_s8 }
  0x16   : > { %s1030_s10 = scalar_lea.sflag [#allocation3], %s162_s28  ;;  %s811_s11 = scalar_lea.hbm %s1019_s6, 512 }
  0x17   : > { %p812_p1 = scmp.ne.s32.totalorder %s1019_s6, %s811_s11  ;;  %p813_p2 = pneg %p1025_p13 }
  0x18   : > { %s816_s21 = scalar_lea.hbm %s1163_s0, 2048  ;;  %p817_p4 = scmp.lt.u32.totalorder %s1019_s6, %s1163_s0 }
  0x19   : > { %p814_p3 = pnand %p813_p2, %p812_p1  ;;  %p818_p6 = scmp.lt.u32.totalorder %s816_s21, %s811_s11 }
  0x1a   : > { %p820_p10 = scmp.lt.u32.totalorder %s811_s11, %s1019_s6 }
  0x1b   : > { %p815_p5 = pneg %p814_p3  ;;  %p819_p7 = por %p818_p6, %p817_p4 }
  0x1d   : > { %p821_p12 = por %p820_p10, %p819_p7 }
  0x1f   : > { %p822_p0 = pnand %p821_p12, %p815_p5 }
  0x21   : > { %825 = shalt.err (!%p822_p0)
}
  0x22   : > { %s826_s28 = scalar_lea.vmem %s1021_s8, 512  ;;  %s925_s29 = smov [#allocation2]  }
  0x23   : > { %p827_p1 = scmp.ne.s32.totalorder %s1021_s8, %s826_s28  ;;  %s831_s30 = sshll.u32 %s925_s29, 4  ;;  %s832_s30 = int_to_ptr.vmem [resolvable:$false] %s831_s30 }
  0x24   : > { %s833_s4 = scalar_lea.vmem %s832_s30, 1024  ;;  %p834_p9 = scmp.lt.s32.totalorder %s1021_s8, %s832_s30 }
  0x25   : > { %p829_p3 = pnand %p827_p1, %p813_p2  ;;  %p835_p4 = scmp.lt.s32.totalorder %s833_s4, %s826_s28 }
  0x27   : > { %p830_p11 = pneg %p829_p3  ;;  %p836_p6 = por %p835_p4, %p834_p9 }
  0x29   : > { %p837_p7 = pnand %p836_p6, %p830_p11 }
  0x2b   : > { %840 = shalt.err (!%p837_p7)
}
  0x2c   : > { %s926_s5 = smov 128   ;;  %s927_s7 = smov 8  }
  0x2d   : > { %752 = dma.hbm_to_vmem [thread:$0]  (!%p1025_p13), %s1019_s6, 512, %s1021_s8, %s1030_s10, %s926_s5, %s926_s5, %s927_s7  }
  0x2e   : > { %p182_p0 = scmp.lt.s32.totalorder %s923_s17, 5  ;;  %p1173_p2 = scmp.ge.s32.totalorder %s923_s17, 1 }
  0x30   : > { %p183_p5 = pnand %p1173_p2, %p182_p0 }
  0x31   : > { %s1062_s11 = sand.u32 (!%p183_p5), 1, %s907_s13  }
  0x32   : > { %186 = sbr.rel (%p183_p5) target bundleno = 516 (0x204), region = 32  ;;  %s655_s18 = sshll.u32 (!%p183_p5), %s1062_s11, 5 }
  0x33   : > { %s189_s19 = scalar_lea.sflag (!%p183_p5), [#allocation3], %s1062_s11  ;;  %s192_s21 = scalar_lea.vmem (!%p183_p5), [#allocation2], %s655_s18 }
  0x39   : > { %894 = dma.done.wait (%p998_p8), %s189_s19, 512  }
  0x3a   : > { %896 = vsyncadd (%p998_p8), %s189_s19, 4294966784  ;;  %vm235_vm0 = vcmask 130048   ;;  %v233_v0 = vld [vmem:[%s1165_s2] sm:$0xff]  ;;  %v234_v1 = vld [vmem:[%s1165_s2 + $0x8] sm:$0xff]  ;;  %s656_s7 = sshll.u32 %s1062_s11, 6  ;;  %vm434_vm1 = vcmask 261120  }
  0x3b   : > { %v229_v2 = vld [vmem:[%s192_s21] sm:$0xff]  ;;  %v731_v3 = vpack.c.bf16 %v234_v1, %v233_v0  ;;  %v231_v4 = vld [vmem:[%s192_s21 + $0x10] sm:$0xff]  ;;  %v230_v5 = vld [vmem:[%s192_s21 + $0x8] sm:$0xff]  ;;  %s219_s18 = scalar_lea.vmem [#allocation5], %s656_s7  ;;  %s530_s9 = scalar_lea.sflag [#allocation4], %s1062_s11 }
  0x3c   : > { %705 = vmatprep.mubr.msk.f32.mxu0 %vm235_vm0, %v229_v2  ;;  %708 = vmatprep.mubr.msk.f32.mxu1 %vm235_vm0, %v231_v4  ;;  %v232_v6 = vld [vmem:[%s192_s21 + $0x18] sm:$0xff]  ;;  %v333_v7 = vld [vmem:[%s1164_s1] sm:$0xff]  ;;  %v334_v14 = vld [vmem:[%s1164_s1 + $0x8] sm:$0xff]  ;;  %s546_s19 = sshll.u32 %s219_s18, 4  ;;  %s682_s21 = sshll.u32 %s915_s15, 10  ;;  %s1104_s19 = int_to_ptr.vmem [resolvable:$true] %s546_s19 }
  0x3d   : > { %732 = vmatprep.subr.bf16.mxu0 %v731_v3  ;;  %743 = vmatprep.subr.bf16.mxu1 %v731_v3  ;;  %v335_v15 = vld [vmem:[%s1164_s1 + $0x10] sm:$0xff]  ;;  %v336_v16 = vld [vmem:[%s1164_s1 + $0x18] sm:$0xff]  ;;  %s1111_s15 = scalar_lea.hbm %s1166_s3, %s682_s21  ;;  %s841_s10 = scalar_lea.vmem %s1104_s19, 1024 }
  0x3e   : > { %734 = vmatpush3.bf16.msra.mxu0 %v731_v3  ;;  %744 = vmatpush3.bf16.msra.mxu1 %v731_v3  ;;  %p842_p8 = scmp.ne.s32.totalorder %s1104_s19, %s841_s10  ;;  %p1174_p9 = scmp.ne.s32.totalorder %s1170_s25, 0 }
  0x3f   : > { %s928_s24 = smov [#allocation5]  }
  0x40   : > { %p843_p11 = pnand %p842_p8, %p1174_p9  ;;  %s845_s22 = sshll.u32 %s928_s24, 4  ;;  %s846_s22 = int_to_ptr.vmem [resolvable:$false] %s845_s22 }
  0x41   : > { %706 = vmatmul.mubr.msk.f32.vlgmr.msra.gmra.mrb[0].mxu0 %vm235_vm0, %v230_v5  ;;  %709 = vmatmul.mubr.msk.f32.vlgmr.msra.gmra.mrb[0].mxu1 %vm235_vm0, %v232_v6  ;;  %s847_s23 = scalar_lea.vmem %s846_s22, 2048  ;;  %p848_p10 = scmp.lt.s32.totalorder %s1104_s19, %s846_s22 }
  0x42   : > { %715 = vmatprep.mubr.msk.f32.mxu1 %vm235_vm0, %v333_v7  ;;  %725 = vmatprep.mubr.msk.f32.mxu0 %vm235_vm0, %v333_v7  ;;  %p844_p13 = pneg %p843_p11  ;;  %p849_p12 = scmp.lt.s32.totalorder %s847_s23, %s841_s10 }
  0x44   : > { %p850_p1 = por %p849_p12, %p848_p10 }
  0x46   : > { %p851_p3 = pnand %p850_p1, %p844_p13 }
 0x114   : > { %v707_v8 = vpop.f32.mrb[0].mxu0  ;;  %v710_v9 = vpop.f32.mrb[0].mxu1 }
 0x115   : > { %v314_v10 = vpop.f32.mrb[1].mxu0  ;;  %v324_v11 = vpop.f32.mrb[1].mxu1 }
 0x116   : > { %v735_v12 = vpack.c.bf16 %v707_v8, %v314_v10  ;;  %v739_v13 = vpack.c.bf16 %v710_v9, %v324_v11 }
 0x118   : > { %736 = vmatprep.subr.bf16.mxu1 %v735_v12  ;;  %740 = vmatprep.subr.bf16.mxu0 %v739_v13 }
 0x119   : > { %738 = vmatpush3.bf16.msra.mxu1 %v735_v12  ;;  %742 = vmatpush3.bf16.msra.mxu0 %v739_v13 }
 0x11c   : > { %716 = vmatmul.mubr.msk.f32.vlgmr.msra.gmra.mrb[2].mxu1 %vm235_vm0, %v334_v14  ;;  %726 = vmatmul.mubr.msk.f32.vlgmr.msra.gmra.mrb[2].mxu0 %vm235_vm0, %v334_v14 }
 0x11d   : > { %718 = vmatprep.mubr.msk.f32.mxu1 %vm235_vm0, %v335_v15  ;;  %728 = vmatprep.mubr.msk.f32.mxu0 %vm235_vm0, %v335_v15 }
 0x120   : > { %719 = vmatmul.mubr.msk.f32.gmra.mrb[4].mxu1 %vm235_vm0, %v336_v16  ;;  %729 = vmatmul.mubr.msk.f32.gmra.mrb[4].mxu0 %vm235_vm0, %v336_v16 }
 0x1ef   : > { %v717_v17 = vpop.f32.mrb[2].mxu1  ;;  %v727_v18 = vpop.f32.mrb[2].mxu0 }
 0x1f0   : > { %436 = vst.msk [vmem:[%s219_s18 + $0x8] sm:$0xff] %vm434_vm1, %v717_v17  ;;  %670 = vst.msk [vmem:[%s219_s18 + $0x28] sm:$0xff] %vm434_vm1, %v727_v18  ;;  %v415_v19 = vpop.f32.mrb[3].mxu1  ;;  %v505_v20 = vpop.f32.mrb[3].mxu0 }
 0x1f1   : > { %435 = vst.msk [vmem:[%s219_s18] sm:$0xff] %vm434_vm1, %v415_v19  ;;  %669 = vst.msk [vmem:[%s219_s18 + $0x20] sm:$0xff] %vm434_vm1, %v505_v20 }
 0x1f3   : > { %v720_v21 = vpop.f32.mrb[4].mxu1  ;;  %v730_v22 = vpop.f32.mrb[4].mxu0 }
 0x1f4   : > { %438 = vst.msk [vmem:[%s219_s18 + $0x18] sm:$0xff] %vm434_vm1, %v720_v21  ;;  %672 = vst.msk [vmem:[%s219_s18 + $0x38] sm:$0xff] %vm434_vm1, %v730_v22  ;;  %v425_v23 = vpop.f32.mrb[5].mxu1  ;;  %v515_v24 = vpop.f32.mrb[5].mxu0 }
 0x1f5   : > { %437 = vst.msk [vmem:[%s219_s18 + $0x10] sm:$0xff] %vm434_vm1, %v425_v23  ;;  %671 = vst.msk [vmem:[%s219_s18 + $0x30] sm:$0xff] %vm434_vm1, %v515_v24 }
 0x1f6   : > { %854 = shalt.err (!%p851_p3)
}
 0x1f7   : > { %s855_s28 = scalar_lea.hbm %s1111_s15, 1024  ;;  %s859_s4 = scalar_lea.hbm %s1166_s3, 4096 }
 0x1f8   : > { %p856_p4 = scmp.ne.s32.totalorder %s1111_s15, %s855_s28  ;;  %p860_p0 = scmp.lt.u32.totalorder %s1111_s15, %s1166_s3 }
 0x1f9   : > { %p861_p2 = scmp.lt.u32.totalorder %s859_s4, %s855_s28  ;;  %p863_p8 = scmp.lt.u32.totalorder %s855_s28, %s1111_s15 }
 0x1fa   : > { %p857_p6 = pnand %p856_p4, %p1174_p9 }
 0x1fb   : > { %p862_p5 = por %p861_p2, %p860_p0 }
 0x1fc   : > { %p858_p7 = pneg %p857_p6 }
 0x1fd   : > { %p864_p11 = por %p863_p8, %p862_p5 }
 0x1ff   : > { %p865_p13 = pnand %p864_p11, %p858_p7 }
 0x201   : > { %868 = shalt.err (!%p865_p13)
}
 0x202   : > { %s929_s18 = smov 128   ;;  %s930_s21 = smov 8  }
 0x203   : > { %747 = dma.vmem_to_hbm [thread:$0]  (%p1174_p9), %s1104_s19, 1024, %s1111_s15, %s530_s9, %s929_s18, %s929_s18, %s930_s21  }
 0x204 PF: > { %p758_p10 = scmp.ge.s32.totalorder %s923_s17, 2  ;;  %s561_s6 = sand.u32 1, %s903_s12  }
 0x205   : > { %p1175_p12 = scmp.ne.s32.totalorder %s1171_s27, 0  ;;  %s562_s8 = scalar_lea.sflag [#allocation4], %s561_s6 }
 0x207   : > { %p754_p1 = pnand %p758_p10, %p1175_p12 }
 0x209   : > { %898 = dma.done.wait (!%p754_p1), %s562_s8, 1024  }
 0x20a   : > { %900 = vsyncadd (!%p754_p1), %s562_s8, 4294966272  ;;  %s19_s17 = sadd.s32 1, %s923_s17   ;;  %s1176_s12 = smov %s907_s13 }
 0x20b   : > { %p16_p3 = scmp.ge.s32.totalorder %s19_s17, 6   ;;  %s1177_s13 = smov %s911_s14 }
 0x20c   : > { %s1178_s14 = smov %s1007_s26  ;;  %s1179_s15 = smov %s919_s16 }
 0x20d   : > { %s1180_s16 = smov %s1182_s20  ;;  %18 = sbr.rel (!%p16_p3) target bundleno = 6 (0x6), region = 81 }
 0x214   :  { %567 = vsyncpa [#allocation3], 1 }
 0x215   :  { %569 = vsyncpa [#allocation3 + $0x1], 1 }
 0x216   :  { %570 = vsyncpa [#allocation4], 1 }
 0x217   :  { %572 = vsyncpa [#allocation4 + $0x1], 1 }

// kernel: tpu_custom_call.1
= control target key start
LH: loop header
LB: loop body
LE: loop exit
PB: predicated region body
PF: predicated region fallthrough
CT: control target
= control target key end

     0   :  { %8 = vsyncpa [#allocation3], 0  ;;  %s1163_s0 = inlined_call_operand.hbm [shape: f32[8,16,16], index: 0, kind: input, shape index: {}]   ;;  %s1164_s1 = inlined_call_operand.vmem [shape: f32[32,16], index: 1, kind: input, shape index: {}]   ;;  %s1165_s2 = inlined_call_operand.vmem [shape: f32[16,32], index: 2, kind: input, shape index: {}]   ;;  %s1166_s3 = inlined_call_operand.hbm [shape: f32[8,32,32], index: 3, kind: output, shape index: {}]  }
   0x1   :  { %10 = vsyncpa [#allocation3 + $0x1], 0 }
   0x2   :  { %11 = vsyncpa [#allocation4], 0 }
   0x3   :  { %13 = vsyncpa [#allocation4 + $0x1], 0  ;;  %s951_s12 = smov 0   ;;  %s953_s13 = smov 0  }
   0x4   :  { %s955_s14 = smov 0   ;;  %s957_s15 = smov 0  }
   0x5   :  { %s959_s16 = smov 0   ;;  %s961_s17 = smov 0  }
   0x6 LB: > { %s645_s18 = sadd.s32 4294967295, %s923_s17   ;;  %s646_s19 = sadd.s32 4294967294, %s923_s17   ;;  %s923_s17 = sphi %s961_s17, %s19_s17   ;;  %s919_s16 = sphi %s959_s16, %s1180_s16   ;;  %s915_s15 = sphi %s957_s15, %s1179_s15   ;;  %s911_s14 = sphi %s955_s14, %s1178_s14   ;;  %s907_s13 = sphi %s953_s13, %s1177_s13   ;;  %s903_s12 = sphi %s951_s12, %s1176_s12  }
   0x7   : > { %s31_s20 = sadd.s32 1, %s919_s16  ;;  %s38_s21 = sadd.s32 1, %s911_s14 }
   0x8   : > { %p33_p0 = scmp.ge.s32.totalorder %s31_s20, 4  ;;  %p45_p1 = scmp.ne.s32.totalorder %s911_s14, %s907_s13 }
   0x9   : > { %p46_p2 = scmp.eq.s32.totalorder %s923_s17, 0  ;;  %p51_p3 = scmp.ne.s32.totalorder %s907_s13, %s903_s12 }
   0xa   : > { %s1182_s20 = smov (%p33_p0, %s31_s20), 0  ;;  %p52_p5 = scmp.eq.s32.totalorder %s645_s18, 0 }
   0xb   : > { %p992_p4 = por %p46_p2, %p45_p1  ;;  %s35_s23 = ssub.s32 %s919_s16, %s1182_s20 }
   0xc   : > { %p124_p6 = scmp.eq.s32.totalorder %s645_s18, 3  ;;  %p36_p7 = scmp.eq.s32.totalorder %s35_s23, 0 }
   0xd   : > { %p998_p8 = por %p52_p5, %p51_p3  ;;  %p130_p10 = scmp.eq.s32.totalorder %s646_s19, 3 }
   0xe   : > { %p1002_p9 = por %p124_p6, %p45_p1  ;;  %p757_p12 = scmp.lt.s32.totalorder %s923_s17, 4 }
   0xf   : > { %s1007_s26 = scalar_select %p36_p7, %s911_s14, %s38_s21  }
  0x10   : > { %s1170_s25 = scalar_select %p1002_p9, 1, 0 }
  0x11   : > { %p1009_p11 = por %p130_p10, %p51_p3  ;;  %s162_s28 = sand.u32 1, %s911_s14  }
  0x12   : > { %s650_s29 = sshll.u32 %s162_s28, 5  ;;  %s680_s30 = sshll.u32 %s919_s16, 9 }
  0x13   : > { %s1171_s27 = scalar_select %p1009_p11, 1, 0 }
  0x14   : > { %s1019_s6 = scalar_lea.hbm %s1163_s0, %s680_s30  ;;  %s166_s7 = scalar_lea.vmem [#allocation2], %s650_s29 }
  0x15   : > { %s174_s8 = sshll.u32 %s166_s7, 4  ;;  %p1025_p13 = pnand %p757_p12, %p992_p4  ;;  %s1021_s8 = int_to_ptr.vmem [resolvable:$true] %s174_s8 }
  0x16   : > { %s1030_s10 = scalar_lea.sflag [#allocation3], %s162_s28  ;;  %s811_s11 = scalar_lea.hbm %s1019_s6, 512 }
  0x17   : > { %p812_p1 = scmp.ne.s32.totalorder %s1019_s6, %s811_s11  ;;  %p813_p2 = pneg %p1025_p13 }
  0x18   : > { %s816_s21 = scalar_lea.hbm %s1163_s0, 2048  ;;  %p817_p4 = scmp.lt.u32.totalorder %s1019_s6, %s1163_s0 }
  0x19   : > { %p814_p3 = pnand %p813_p2, %p812_p1  ;;  %p818_p6 = scmp.lt.u32.totalorder %s816_s21, %s811_s11 }
  0x1a   : > { %p820_p10 = scmp.lt.u32.totalorder %s811_s11, %s1019_s6 }
  0x1b   : > { %p815_p5 = pneg %p814_p3  ;;  %p819_p7 = por %p818_p6, %p817_p4 }
  0x1d   : > { %p821_p12 = por %p820_p10, %p819_p7 }
  0x1f   : > { %p822_p0 = pnand %p821_p12, %p815_p5 }
  0x21   : > { %825 = shalt.err (!%p822_p0)
}
  0x22   : > { %s826_s28 = scalar_lea.vmem %s1021_s8, 512  ;;  %s925_s29 = smov [#allocation2]  }
  0x23   : > { %p827_p1 = scmp.ne.s32.totalorder %s1021_s8, %s826_s28  ;;  %s831_s30 = sshll.u32 %s925_s29, 4  ;;  %s832_s30 = int_to_ptr.vmem [resolvable:$false] %s831_s30 }
  0x24   : > { %s833_s4 = scalar_lea.vmem %s832_s30, 1024  ;;  %p834_p9 = scmp.lt.s32.totalorder %s1021_s8, %s832_s30 }
  0x25   : > { %p829_p3 = pnand %p827_p1, %p813_p2  ;;  %p835_p4 = scmp.lt.s32.totalorder %s833_s4, %s826_s28 }
  0x27   : > { %p830_p11 = pneg %p829_p3  ;;  %p836_p6 = por %p835_p4, %p834_p9 }
  0x29   : > { %p837_p7 = pnand %p836_p6, %p830_p11 }
  0x2b   : > { %840 = shalt.err (!%p837_p7)
}
  0x2c   : > { %s926_s5 = smov 128   ;;  %s927_s7 = smov 8  }
  0x2d   : > { %752 = dma.hbm_to_vmem [thread:$0]  (!%p1025_p13), %s1019_s6, 512, %s1021_s8, %s1030_s10, %s926_s5, %s926_s5, %s927_s7  }
  0x2e   : > { %p182_p0 = scmp.lt.s32.totalorder %s923_s17, 5  ;;  %p1173_p2 = scmp.ge.s32.totalorder %s923_s17, 1 }
  0x30   : > { %p183_p5 = pnand %p1173_p2, %p182_p0 }
  0x31   : > { %s1062_s11 = sand.u32 (!%p183_p5), 1, %s907_s13  }
  0x32   : > { %186 = sbr.rel (%p183_p5) target bundleno = 516 (0x204), region = 32  ;;  %s655_s18 = sshll.u32 (!%p183_p5), %s1062_s11, 5 }
  0x33   : > { %s189_s19 = scalar_lea.sflag (!%p183_p5), [#allocation3], %s1062_s11  ;;  %s192_s21 = scalar_lea.vmem (!%p183_p5), [#allocation2], %s655_s18 }
  0x39   : > { %894 = dma.done.wait (%p998_p8), %s189_s19, 512  }
  0x3a   : > { %896 = vsyncadd (%p998_p8), %s189_s19, 4294966784  ;;  %vm235_vm0 = vcmask 130048   ;;  %v233_v0 = vld [vmem:[%s1165_s2] sm:$0xff]  ;;  %v234_v1 = vld [vmem:[%s1165_s2 + $0x8] sm:$0xff]  ;;  %s656_s7 = sshll.u32 %s1062_s11, 6  ;;  %vm434_vm1 = vcmask 261120  }
  0x3b   : > { %v229_v2 = vld [vmem:[%s192_s21] sm:$0xff]  ;;  %v731_v3 = vpack.c.bf16 %v234_v1, %v233_v0  ;;  %v231_v4 = vld [vmem:[%s192_s21 + $0x10] sm:$0xff]  ;;  %v230_v5 = vld [vmem:[%s192_s21 + $0x8] sm:$0xff]  ;;  %s219_s18 = scalar_lea.vmem [#allocation5], %s656_s7  ;;  %s530_s9 = scalar_lea.sflag [#allocation4], %s1062_s11 }
  0x3c   : > { %705 = vmatprep.mubr.msk.f32.mxu0 %vm235_vm0, %v229_v2  ;;  %708 = vmatprep.mubr.msk.f32.mxu1 %vm235_vm0, %v231_v4  ;;  %v232_v6 = vld [vmem:[%s192_s21 + $0x18] sm:$0xff]  ;;  %v333_v7 = vld [vmem:[%s1164_s1] sm:$0xff]  ;;  %v334_v14 = vld [vmem:[%s1164_s1 + $0x8] sm:$0xff]  ;;  %s546_s19 = sshll.u32 %s219_s18, 4  ;;  %s682_s21 = sshll.u32 %s915_s15, 10  ;;  %s1104_s19 = int_to_ptr.vmem [resolvable:$true] %s546_s19 }
  0x3d   : > { %732 = vmatprep.subr.bf16.mxu0 %v731_v3  ;;  %743 = vmatprep.subr.bf16.mxu1 %v731_v3  ;;  %v335_v15 = vld [vmem:[%s1164_s1 + $0x10] sm:$0xff]  ;;  %v336_v16 = vld [vmem:[%s1164_s1 + $0x18] sm:$0xff]  ;;  %s1111_s15 = scalar_lea.hbm %s1166_s3, %s682_s21  ;;  %s841_s10 = scalar_lea.vmem %s1104_s19, 1024 }
  0x3e   : > { %734 = vmatpush3.bf16.msra.mxu0 %v731_v3  ;;  %744 = vmatpush3.bf16.msra.mxu1 %v731_v3  ;;  %p842_p8 = scmp.ne.s32.totalorder %s1104_s19, %s841_s10  ;;  %p1174_p9 = scmp.ne.s32.totalorder %s1170_s25, 0 }
  0x3f   : > { %s928_s24 = smov [#allocation5]  }
  0x40   : > { %p843_p11 = pnand %p842_p8, %p1174_p9  ;;  %s845_s22 = sshll.u32 %s928_s24, 4  ;;  %s846_s22 = int_to_ptr.vmem [resolvable:$false] %s845_s22 }
  0x41   : > { %706 = vmatmul.mubr.msk.f32.vlgmr.msra.gmra.mrb[0].mxu0 %vm235_vm0, %v230_v5  ;;  %709 = vmatmul.mubr.msk.f32.vlgmr.msra.gmra.mrb[0].mxu1 %vm235_vm0, %v232_v6  ;;  %s847_s23 = scalar_lea.vmem %s846_s22, 2048  ;;  %p848_p10 = scmp.lt.s32.totalorder %s1104_s19, %s846_s22 }
  0x42   : > { %715 = vmatprep.mubr.msk.f32.mxu1 %vm235_vm0, %v333_v7  ;;  %725 = vmatprep.mubr.msk.f32.mxu0 %vm235_vm0, %v333_v7  ;;  %p844_p13 = pneg %p843_p11  ;;  %p849_p12 = scmp.lt.s32.totalorder %s847_s23, %s841_s10 }
  0x44   : > { %p850_p1 = por %p849_p12, %p848_p10 }
  0x46   : > { %p851_p3 = pnand %p850_p1, %p844_p13 }
 0x114   : > { %v707_v8 = vpop.f32.mrb[0].mxu0  ;;  %v710_v9 = vpop.f32.mrb[0].mxu1 }
 0x115   : > { %v314_v10 = vpop.f32.mrb[1].mxu0  ;;  %v324_v11 = vpop.f32.mrb[1].mxu1 }
 0x116   : > { %v735_v12 = vpack.c.bf16 %v707_v8, %v314_v10  ;;  %v739_v13 = vpack.c.bf16 %v710_v9, %v324_v11 }
 0x118   : > { %736 = vmatprep.subr.bf16.mxu1 %v735_v12  ;;  %740 = vmatprep.subr.bf16.mxu0 %v739_v13 }
 0x119   : > { %738 = vmatpush3.bf16.msra.mxu1 %v735_v12  ;;  %742 = vmatpush3.bf16.msra.mxu0 %v739_v13 }
 0x11c   : > { %716 = vmatmul.mubr.msk.f32.vlgmr.msra.gmra.mrb[2].mxu1 %vm235_vm0, %v334_v14  ;;  %726 = vmatmul.mubr.msk.f32.vlgmr.msra.gmra.mrb[2].mxu0 %vm235_vm0, %v334_v14 }
 0x11d   : > { %718 = vmatprep.mubr.msk.f32.mxu1 %vm235_vm0, %v335_v15  ;;  %728 = vmatprep.mubr.msk.f32.mxu0 %vm235_vm0, %v335_v15 }
 0x120   : > { %719 = vmatmul.mubr.msk.f32.gmra.mrb[4].mxu1 %vm235_vm0, %v336_v16  ;;  %729 = vmatmul.mubr.msk.f32.gmra.mrb[4].mxu0 %vm235_vm0, %v336_v16 }
 0x1ef   : > { %v717_v17 = vpop.f32.mrb[2].mxu1  ;;  %v727_v18 = vpop.f32.mrb[2].mxu0 }
 0x1f0   : > { %436 = vst.msk [vmem:[%s219_s18 + $0x8] sm:$0xff] %vm434_vm1, %v717_v17  ;;  %670 = vst.msk [vmem:[%s219_s18 + $0x28] sm:$0xff] %vm434_vm1, %v727_v18  ;;  %v415_v19 = vpop.f32.mrb[3].mxu1  ;;  %v505_v20 = vpop.f32.mrb[3].mxu0 }
 0x1f1   : > { %435 = vst.msk [vmem:[%s219_s18] sm:$0xff] %vm434_vm1, %v415_v19  ;;  %669 = vst.msk [vmem:[%s219_s18 + $0x20] sm:$0xff] %vm434_vm1, %v505_v20 }
 0x1f3   : > { %v720_v21 = vpop.f32.mrb[4].mxu1  ;;  %v730_v22 = vpop.f32.mrb[4].mxu0 }
 0x1f4   : > { %438 = vst.msk [vmem:[%s219_s18 + $0x18] sm:$0xff] %vm434_vm1, %v720_v21  ;;  %672 = vst.msk [vmem:[%s219_s18 + $0x38] sm:$0xff] %vm434_vm1, %v730_v22  ;;  %v425_v23 = vpop.f32.mrb[5].mxu1  ;;  %v515_v24 = vpop.f32.mrb[5].mxu0 }
 0x1f5   : > { %437 = vst.msk [vmem:[%s219_s18 + $0x10] sm:$0xff] %vm434_vm1, %v425_v23  ;;  %671 = vst.msk [vmem:[%s219_s18 + $0x30] sm:$0xff] %vm434_vm1, %v515_v24 }
 0x1f6   : > { %854 = shalt.err (!%p851_p3)
}
 0x1f7   : > { %s855_s28 = scalar_lea.hbm %s1111_s15, 1024  ;;  %s859_s4 = scalar_lea.hbm %s1166_s3, 4096 }
 0x1f8   : > { %p856_p4 = scmp.ne.s32.totalorder %s1111_s15, %s855_s28  ;;  %p860_p0 = scmp.lt.u32.totalorder %s1111_s15, %s1166_s3 }
 0x1f9   : > { %p861_p2 = scmp.lt.u32.totalorder %s859_s4, %s855_s28  ;;  %p863_p8 = scmp.lt.u32.totalorder %s855_s28, %s1111_s15 }
 0x1fa   : > { %p857_p6 = pnand %p856_p4, %p1174_p9 }
 0x1fb   : > { %p862_p5 = por %p861_p2, %p860_p0 }
 0x1fc   : > { %p858_p7 = pneg %p857_p6 }
 0x1fd   : > { %p864_p11 = por %p863_p8, %p862_p5 }
 0x1ff   : > { %p865_p13 = pnand %p864_p11, %p858_p7 }
 0x201   : > { %868 = shalt.err (!%p865_p13)
}
 0x202   : > { %s929_s18 = smov 128   ;;  %s930_s21 = smov 8  }
 0x203   : > { %747 = dma.vmem_to_hbm [thread:$0]  (%p1174_p9), %s1104_s19, 1024, %s1111_s15, %s530_s9, %s929_s18, %s929_s18, %s930_s21  }
 0x204 PF: > { %p758_p10 = scmp.ge.s32.totalorder %s923_s17, 2  ;;  %s561_s6 = sand.u32 1, %s903_s12  }
 0x205   : > { %p1175_p12 = scmp.ne.s32.totalorder %s1171_s27, 0  ;;  %s562_s8 = scalar_lea.sflag [#allocation4], %s561_s6 }
 0x207   : > { %p754_p1 = pnand %p758_p10, %p1175_p12 }
 0x209   : > { %898 = dma.done.wait (!%p754_p1), %s562_s8, 1024  }
 0x20a   : > { %900 = vsyncadd (!%p754_p1), %s562_s8, 4294966272  ;;  %s19_s17 = sadd.s32 1, %s923_s17   ;;  %s1176_s12 = smov %s907_s13 }
 0x20b   : > { %p16_p3 = scmp.ge.s32.totalorder %s19_s17, 6   ;;  %s1177_s13 = smov %s911_s14 }
 0x20c   : > { %s1178_s14 = smov %s1007_s26  ;;  %s1179_s15 = smov %s919_s16 }
 0x20d   : > { %s1180_s16 = smov %s1182_s20  ;;  %18 = sbr.rel (!%p16_p3) target bundleno = 6 (0x6), region = 81 }
 0x214   :  { %567 = vsyncpa [#allocation3], 1 }
 0x215   :  { %569 = vsyncpa [#allocation3 + $0x1], 1 }
 0x216   :  { %570 = vsyncpa [#allocation4], 1 }
 0x217   :  { %572 = vsyncpa [#allocation4 + $0x1], 1 }

</bundles_post_ra>
